<compile_context>
chip_gen: v6e
topology: v6e:2x2x1
jax: 0.10.0
libtpu: 0.0.40
codegen_flags: <defaults>
</compile_context>

<pallas_src>
import math
from functools import partial

import jax
import jax.numpy as jnp
from jax import lax
from jax.experimental import pallas as pl
from jax.experimental.pallas import tpu as pltpu


# --------------------------------------------------------------------------
# Hardware / sizing helpers
# --------------------------------------------------------------------------

def _round_up(v, m):
    return (v + m - 1) // m * m


def _sublane_count(dtype):
    its = jnp.dtype(dtype).itemsize
    return max(8, 32 // max(1, its))          # f32 -> 8, bf16 -> 16, int8 -> 32


def _vmem_capacity_bytes():
    try:
        info = pltpu.get_tpu_info()
        cap = getattr(info, "vmem_capacity_bytes", None)
        if cap:
            return int(cap)
    except Exception:
        pass
    return 64 << 20                            # conservative: smallest gen (v7x)


def _num_tensorcores():
    try:
        info = pltpu.get_tpu_info()
        n = getattr(info, "num_cores", None)
        if n:
            return int(n)
    except Exception:
        pass
    try:
        return max(1, int(getattr(jax.devices()[0], "num_cores", 1)))
    except Exception:
        return 1


def _divisors(n):
    ds = set()
    i = 1
    while i * i <= n:
        if n % i == 0:
            ds.add(i)
            ds.add(n // i)
        i += 1
    return sorted(ds)


def _choose_batch_tile(B, per_batch_bytes, target_bytes, min_steps):
    """Largest divisor of B whose padded block fits target; prefer keeping
    at least `min_steps` grid steps (only matters on multi-core chips)."""
    fitting = [d for d in _divisors(B) if d * per_batch_bytes <= target_bytes]
    if not fitting:
        return 1
    preferred = [d for d in fitting if B // d >= min_steps]
    return max(preferred) if preferred else max(fitting)


def _choose_hw_tile(HW, c_pad, itemsize, target_bytes):
    def fits(t):
        return c_pad * _round_up(t, 128) * itemsize <= target_bytes
    divs = _divisors(HW)
    aligned = [d for d in divs if d % 128 == 0 and fits(d)]
    if aligned:
        return max(aligned)
    fitting = [d for d in divs if fits(d)]
    return max(fitting) if fitting else 1


# --------------------------------------------------------------------------
# Single-pass kernel (whole (TB, C, HW) block in VMEM)
# --------------------------------------------------------------------------

def _eca_kernel(w_ref, x_ref, o_ref, *, k, pad, use_roll):
    # w_ref: (k,) f32 conv taps in SMEM (scalar prefetch)
    # x_ref / o_ref: (TB, C, HW) blocks, spatial dim on lanes
    x = x_ref[...]                                       # (TB, C, HW)
    TB, C, _ = x.shape

    # Per-channel spatial descriptors (reduce over the lane axis), f32 accum.
    avg = jnp.mean(x, axis=-1, dtype=jnp.float32)        # (TB, C)
    mx = jnp.max(x, axis=-1).astype(jnp.float32)         # (TB, C)
    # Conv is linear and bias-free: conv(avg) + conv(max) == conv(avg + max).
    pooled = avg + mx                                    # (TB, C) f32

    if use_roll:
        # k-tap shift-and-FMA: y[c] = sum_j w[j] * pooled[c + j - pad],
        # zero-padded at the channel edges.  Rolls hit the XLU slot, FMAs the
        # VPU; no O(C^2) transient.
        ch = lax.broadcasted_iota(jnp.int32, (TB, C), 1)
        y = jnp.zeros((TB, C), jnp.float32)
        for j in range(k):                               # k is tiny and static
            s = pad - j
            rolled = pooled if s == 0 else pltpu.roll(pooled, shift=s % C, axis=1)
            src = ch - s                                 # = c + j - pad
            valid = (src >= 0) & (src < C)
            y = y + w_ref[j] * jnp.where(valid, rolled, 0.0)
    else:
        # Small / unaligned C: tiny band matrix built on the fly (few KiB,
        # never touches HBM); MXU has plenty of slack in this HBM-bound kernel.
        # TODO(synk): large C that is not a multiple of 128 still takes this
        # path; extend the roll path with unaligned-size support if needed.
        ci = lax.broadcasted_iota(jnp.int32, (C, C), 0)  # c_in
        co = lax.broadcasted_iota(jnp.int32, (C, C), 1)  # c_out
        tap = ci - co + pad
        band = jnp.where(tap == 0, w_ref[0], 0.0)
        for j in range(1, k):
            band = band + jnp.where(tap == j, w_ref[j], 0.0)
        y = jnp.dot(pooled, band, preferred_element_type=jnp.float32)

    att = jax.nn.sigmoid(y)                              # (TB, C) f32
    scale = att.astype(o_ref.dtype)[:, :, None]          # (TB, C, 1)

    # Re-read x_ref at the store so the whole block value is not kept live
    # across the pool/conv/sigmoid section (load bandwidth has slack; a live
    # whole-block copy / vreg spill would not).
    o_ref[...] = (x_ref[...] * scale).astype(o_ref.dtype)


# --------------------------------------------------------------------------
# Two-pass spatially-tiled fallback (for blocks too large for VMEM)
# --------------------------------------------------------------------------

def _pool_partial_kernel(x_ref, sum_ref, max_ref):
    x = x_ref[...]                                       # (1, C, thw)
    sum_ref[...] = jnp.sum(x, axis=-1, dtype=jnp.float32)[:, None, None, :]
    max_ref[...] = jnp.max(x, axis=-1).astype(jnp.float32)[:, None, None, :]


def _scale_kernel(att_ref, x_ref, o_ref):
    scale = att_ref[...].astype(o_ref.dtype)             # (1, C, 1)
    o_ref[...] = (x_ref[...] * scale).astype(o_ref.dtype)


def _conv1d_channels(v, w):
    """Cross-correlate (B, C) along C with zero padding; mirrors nn.Conv1d."""
    k = w.shape[0]
    pad = (k - 1) // 2
    C = v.shape[1]
    vp = jnp.pad(v, ((0, 0), (pad, pad)))
    return sum(w[j] * vp[:, j:j + C] for j in range(k))


def _eca_forward_two_pass(x, conv_weight, hw_tile=None):
    """Pool pass + scale pass; used when one (1, C, HW) block can't be
    double-buffered in VMEM (costs ~1.5x HBM traffic but always fits)."""
    B, C, H, W = x.shape
    HW = H * W
    itemsize = x.dtype.itemsize
    x3 = x.reshape(B, C, HW)

    capacity = _vmem_capacity_bytes()
    budget = min(int(capacity * 0.85), 100 << 20)
    target = max(1 << 20, min(12 << 20, budget // 6))
    c_pad = _round_up(C, _sublane_count(x.dtype))

    if hw_tile is None:
        thw = _choose_hw_tile(HW, c_pad, itemsize, target)
    else:
        thw = int(hw_tile)
    assert HW % thw == 0, "hw tile must divide H*W"
    n_t = HW // thw

    block_bytes = c_pad * _round_up(thw, 128) * itemsize
    vmem1 = int(min(budget, max(32 << 20, 3 * block_bytes + (4 << 20))))
    vmem2 = int(min(budget, max(32 << 20, 5 * block_bytes + (4 << 20))))

    # Pass 1: per-tile partial sum / max over the spatial axis.
    sums, maxes = pl.pallas_call(
        _pool_partial_kernel,
        out_shape=(jax.ShapeDtypeStruct((B, n_t, 1, C), jnp.float32),
                   jax.ShapeDtypeStruct((B, n_t, 1, C), jnp.float32)),
        grid=(B, n_t),
        in_specs=[pl.BlockSpec((1, C, thw), lambda b, t: (b, 0, t))],
        out_specs=(pl.BlockSpec((1, 1, 1, C), lambda b, t: (b, t, 0, 0)),
                   pl.BlockSpec((1, 1, 1, C), lambda b, t: (b, t, 0, 0))),
        compiler_params=pltpu.CompilerParams(
            dimension_semantics=("parallel", "parallel"),
            vmem_limit_bytes=vmem1),
        cost_estimate=pl.CostEstimate(
            flops=2 * B * C * HW, transcendentals=0,
            bytes_accessed=B * C * HW * itemsize + 2 * B * n_t * C * 4),
    )(x3)

    pooled = sums[:, :, 0, :].sum(axis=1) / float(HW) + maxes[:, :, 0, :].max(axis=1)
    att = jax.nn.sigmoid(_conv1d_channels(pooled, conv_weight.astype(jnp.float32)))
    att3 = att.reshape(B, C, 1)

    # Pass 2: stream x again and apply the per-channel sigmoid scale.
    out3 = pl.pallas_call(
        _scale_kernel,
        out_shape=jax.ShapeDtypeStruct((B, C, HW), x.dtype),
        grid=(B, n_t),
        in_specs=[pl.BlockSpec((1, C, 1), lambda b, t: (b, 0, 0)),
                  pl.BlockSpec((1, C, thw), lambda b, t: (b, 0, t))],
        out_specs=pl.BlockSpec((1, C, thw), lambda b, t: (b, 0, t)),
        compiler_params=pltpu.CompilerParams(
            dimension_semantics=("parallel", "parallel"),
            vmem_limit_bytes=vmem2),
        cost_estimate=pl.CostEstimate(
            flops=B * C * HW, transcendentals=0,
            bytes_accessed=2 * B * C * HW * itemsize + B * C * 4),
    )(att3, x3)

    return out3.reshape(B, C, H, W)


# --------------------------------------------------------------------------
# Public forward
# --------------------------------------------------------------------------

def eca_forward(x, conv_weight):
    """x: (B, C, H, W); conv_weight: (k,) taps of Conv1d(1, 1, k, bias=False)."""
    B, C, H, W = x.shape
    HW = H * W
    k = conv_weight.shape[0]
    pad = (k - 1) // 2
    itemsize = x.dtype.itemsize

    capacity = _vmem_capacity_bytes()
    budget = min(int(capacity * 0.85), 100 << 20)     # <=100 MiB on v5e/v6e, ~54 MiB on v7x

    # Padded block accounting: VMEM tiles are (sublane, 128)-padded.
    c_pad = _round_up(C, _sublane_count(x.dtype))
    hw_pad = _round_up(HW, 128)
    per_batch_padded = c_pad * hw_pad * itemsize

    # Fallback: a single image block can't be double-buffered within budget.
    if 4 * per_batch_padded + (8 << 20) > budget:
        return _eca_forward_two_pass(x, conv_weight)

    target_block = max(1 << 20, min(12 << 20, budget // 5))
    min_steps = 4 if _num_tensorcores() >= 2 else 1
    TB = _choose_batch_tile(B, per_batch_padded, target_block, min_steps)
    block_bytes = TB * per_batch_padded
    vmem_limit = int(min(budget, max(32 << 20, 4 * block_bytes + (8 << 20))))

    x3 = x.reshape(B, C, HW)
    use_roll = (C % 128 == 0)                          # lane-aligned channel axis
    kernel = partial(_eca_kernel, k=k, pad=pad, use_roll=use_roll)

    ce = pl.CostEstimate(
        flops=3 * B * C * HW + 4 * B * C * k,
        transcendentals=B * C,
        bytes_accessed=2 * B * C * HW * itemsize + B * C * 4 + k * 4,
    )

    out3 = pl.pallas_call(
        kernel,
        out_shape=jax.ShapeDtypeStruct((B, C, HW), x.dtype),
        grid_spec=pltpu.PrefetchScalarGridSpec(
            num_scalar_prefetch=1,                     # conv taps -> SMEM
            grid=(B // TB,),
            in_specs=[pl.BlockSpec((TB, C, HW), lambda b, w: (b, 0, 0))],
            out_specs=pl.BlockSpec((TB, C, HW), lambda b, w: (b, 0, 0)),
        ),
        compiler_params=pltpu.CompilerParams(
            dimension_semantics=("parallel",),
            vmem_limit_bytes=vmem_limit,
        ),
        cost_estimate=ce,
    )(conv_weight.astype(jnp.float32), x3)

    return out3.reshape(B, C, H, W)


# --------------------------------------------------------------------------
# Pure-JAX reference (mirrors the PyTorch forward)
# --------------------------------------------------------------------------

def eca_reference(x, conv_weight):
    xf = x.astype(jnp.float32)
    avg = jnp.mean(xf, axis=(2, 3))                    # (B, C)
    mx = jnp.max(xf, axis=(2, 3))                      # (B, C)
    w = conv_weight.astype(jnp.float32)
    y = _conv1d_channels(avg, w) + _conv1d_channels(mx, w)
    att = jax.nn.sigmoid(y)[:, :, None, None]
    return (xf * att).astype(x.dtype)


if __name__ == "__main__":
    B, C, H, W = 2, 8, 16, 16
    gamma, b_param = 2, 1
    t = int(abs((math.log(C, 2) + b_param) / gamma))
    k_size = t if t % 2 else t + 1                     # C=8 -> k_size=3

    key = jax.random.PRNGKey(0)
    kx, kw = jax.random.split(key)
    x = jax.random.normal(kx, (B, C, H, W), dtype=jnp.float32)
    # Deterministic Conv1d(1, 1, k_size, bias=False) weight, shape (k,)
    bound = 1.0 / math.sqrt(k_size)
    conv_weight = jax.random.uniform(
        kw, (k_size,), dtype=jnp.float32, minval=-bound, maxval=bound
    )

    ref = eca_reference(x, conv_weight)

    out = jax.block_until_ready(eca_forward(x, conv_weight))
    assert jnp.allclose(out, ref, atol=1e-5, rtol=1e-5), "single-pass kernel mismatch"

    # Also exercise the two-pass spatially-tiled fallback path on small shapes.
    out2 = jax.block_until_ready(_eca_forward_two_pass(x, conv_weight, hw_tile=128))
    assert jnp.allclose(out2, ref, atol=1e-5, rtol=1e-5), "two-pass fallback mismatch"

    print("KERNEL_OK")
</pallas_src>

<mosaic_0001>
module attributes {stable_mosaic.version = 11 : i64} {
  func.func @_eca_kernel(%arg0: i32, %arg1: memref<3xf32, #tpu.memory_space<smem>>, %arg2: memref<2x8x256xf32, #tpu.memory_space<vmem>>, %arg3: memref<2x8x256xf32, #tpu.memory_space<vmem>>) attributes {dimension_semantics = [#tpu.dimension_semantics<parallel>], iteration_bounds = array<i64: 1>, scalar_prefetch = 1 : i64, scratch_operands = 0 : i64, tpu.core_type = #tpu.core_type<tc>, window_params = [{transform_indices = @transform_0, window_bounds = array<i64: 2, 8, 256>}, {transform_indices = @transform_1, window_bounds = array<i64: 2, 8, 256>}]} {
    %c0 = arith.constant 0 : index
    %c0_0 = arith.constant 0 : index
    %c0_1 = arith.constant 0 : index
    %0 = vector.load %arg2[%c0, %c0_0, %c0_1] : memref<2x8x256xf32, #tpu.memory_space<vmem>>, vector<2x8x256xf32>
    %cst = arith.constant dense<0.000000e+00> : vector<2x8xf32>
    %1 = vector.multi_reduction <add>, %0, %cst [2] : vector<2x8x256xf32> to vector<2x8xf32>
    %cst_2 = arith.constant 2.560000e+02 : f32
    %2 = vector.broadcast %cst_2 : f32 to vector<2x8xf32>
    %3 = arith.divf %1, %2 : vector<2x8xf32>
    %cst_3 = arith.constant dense<0xFF800000> : vector<2x8xf32>
    %4 = vector.multi_reduction <maximumf>, %0, %cst_3 [2] : vector<2x8x256xf32> to vector<2x8xf32>
    %5 = arith.addf %3, %4 : vector<2x8xf32>
    %6 = tpu.iota {dimensions = array<i32: 0>} : vector<8x8xi32>
    %7 = tpu.iota {dimensions = array<i32: 1>} : vector<8x8xi32>
    %8 = arith.subi %6, %7 : vector<8x8xi32>
    %c1_i32 = arith.constant 1 : i32
    %9 = vector.broadcast %c1_i32 : i32 to vector<8x8xi32>
    %10 = arith.addi %8, %9 : vector<8x8xi32>
    %c0_i32 = arith.constant 0 : i32
    %11 = vector.broadcast %c0_i32 : i32 to vector<8x8xi32>
    %12 = arith.cmpi eq, %10, %11 : vector<8x8xi32>
    %c0_4 = arith.constant 0 : index
    %13 = memref.load %arg1[%c0_4] : memref<3xf32, #tpu.memory_space<smem>>
    %cst_5 = arith.constant 0.000000e+00 : f32
    %14 = vector.broadcast %13 : f32 to vector<8x8xf32>
    %15 = vector.broadcast %cst_5 : f32 to vector<8x8xf32>
    %16 = arith.select %12, %14, %15 : vector<8x8xi1>, vector<8x8xf32>
    %c1_i32_6 = arith.constant 1 : i32
    %17 = vector.broadcast %c1_i32_6 : i32 to vector<8x8xi32>
    %18 = arith.cmpi eq, %10, %17 : vector<8x8xi32>
    %c1 = arith.constant 1 : index
    %19 = memref.load %arg1[%c1] : memref<3xf32, #tpu.memory_space<smem>>
    %cst_7 = arith.constant 0.000000e+00 : f32
    %20 = vector.broadcast %19 : f32 to vector<8x8xf32>
    %21 = vector.broadcast %cst_7 : f32 to vector<8x8xf32>
    %22 = arith.select %18, %20, %21 : vector<8x8xi1>, vector<8x8xf32>
    %23 = arith.addf %16, %22 : vector<8x8xf32>
    %c2_i32 = arith.constant 2 : i32
    %24 = vector.broadcast %c2_i32 : i32 to vector<8x8xi32>
    %25 = arith.cmpi eq, %10, %24 : vector<8x8xi32>
    %c2 = arith.constant 2 : index
    %26 = memref.load %arg1[%c2] : memref<3xf32, #tpu.memory_space<smem>>
    %cst_8 = arith.constant 0.000000e+00 : f32
    %27 = vector.broadcast %26 : f32 to vector<8x8xf32>
    %28 = vector.broadcast %cst_8 : f32 to vector<8x8xf32>
    %29 = arith.select %25, %27, %28 : vector<8x8xi1>, vector<8x8xf32>
    %30 = arith.addf %23, %29 : vector<8x8xf32>
    %cst_9 = arith.constant dense<0.000000e+00> : vector<2x8xf32>
    %31 = tpu.matmul %5, %30, %cst_9 {dimension_numbers = #tpu.dot_dimension_numbers<[1], [0], [0], [1], [0, 0, 1, 1], [], []>} : vector<2x8xf32>, vector<8x8xf32>, vector<2x8xf32> -> vector<2x8xf32>
    %32 = arith.negf %31 : vector<2x8xf32>
    %33 = math.exp %32 : vector<2x8xf32>
    %cst_10 = arith.constant 1.000000e+00 : f32
    %34 = vector.broadcast %cst_10 : f32 to vector<2x8xf32>
    %35 = arith.addf %34, %33 : vector<2x8xf32>
    %36 = arith.divf %34, %35 : vector<2x8xf32>
    %37 = vector.shape_cast %36 : vector<2x8xf32> to vector<2x8x1xf32>
    %c0_11 = arith.constant 0 : index
    %c0_12 = arith.constant 0 : index
    %c0_13 = arith.constant 0 : index
    %38 = vector.load %arg2[%c0_11, %c0_12, %c0_13] : memref<2x8x256xf32, #tpu.memory_space<vmem>>, vector<2x8x256xf32>
    %39 = vector.broadcast %37 : vector<2x8x1xf32> to vector<2x8x256xf32>
    %40 = arith.mulf %38, %39 : vector<2x8x256xf32>
    %c0_14 = arith.constant 0 : index
    %c0_15 = arith.constant 0 : index
    %c0_16 = arith.constant 0 : index
    %41 = vector.load %arg3[%c0_14, %c0_15, %c0_16] : memref<2x8x256xf32, #tpu.memory_space<vmem>>, vector<2x8x256xf32>
    tpu.vector_store %arg3[%c0_14, %c0_15, %c0_16], %40 {strides = array<i32>} : memref<2x8x256xf32, #tpu.memory_space<vmem>>, vector<2x8x256xf32>,
    return
  }
  func.func @transform_0(%arg0: i32, %arg1: memref<3xf32, #tpu.memory_space<smem>>) -> (i32, i32, i32) {
    %c0_i32 = arith.constant 0 : i32
    %c0_i32_0 = arith.constant 0 : i32
    %c0_i32_1 = arith.constant 0 : i32
    return %arg0, %c0_i32, %c0_i32_0 : i32, i32, i32
  }
  func.func @transform_1(%arg0: i32, %arg1: memref<3xf32, #tpu.memory_space<smem>>) -> (i32, i32, i32) {
    %c0_i32 = arith.constant 0 : i32
    %c0_i32_0 = arith.constant 0 : i32
    %c0_i32_1 = arith.constant 0 : i32
    return %arg0, %c0_i32, %c0_i32_0 : i32, i32, i32
  }
}

</mosaic_0001>

<bundles_post_ra>
// kernel: tpu_custom_call.1
= control target key start
LH: loop header
LB: loop body
LE: loop exit
PB: predicated region body
PF: predicated region fallthrough
CT: control target
= control target key end

     0   :  { %s275_s9 = smov [#allocation3]   ;;  %s332_s0 = inlined_call_operand.hbm [shape: f32[3], index: 0, kind: input, shape index: {}]   ;;  %s333_s1 = inlined_call_operand.hbm [shape: f32[2,8,256], index: 1, kind: input, shape index: {}]   ;;  %s334_s2 = inlined_call_operand.hbm [shape: f32[2,8,256], index: 2, kind: output, shape index: {}]  }
   0x1   :  { %8 = dma.hbm_to_smem %s332_s0, 16, %s275_s9, [#allocation2] }
   0x2   :  { %269 = dma.done.wait [#allocation2], 16 }
   0x3   :  { %270 = vsyncadd [#allocation2], 4294967280 }
   0x4   :  { %10 = sfence }
   0x5   :  { %11 = vsyncpa [#allocation5], 0 }
   0x6   :  { %12 = vsyncpa [#allocation6], 0  ;;  %s276_s12 = smov [#allocation4]  }
   0x7   :  { %s18_s13 = sshll.u32 %s276_s12, 4  ;;  %s19_s13 = int_to_ptr.vmem [resolvable:$true] %s18_s13 }
   0x8   :  { %s237_s14 = scalar_lea.vmem %s19_s13, 512  ;;  %p242_p1 = scmp.lt.s32.totalorder %s19_s13, %s19_s13 }
   0x9   :  { %p238_p0 = scmp.ne.s32.totalorder %s19_s13, %s237_s14  ;;  %p243_p2 = scmp.lt.s32.totalorder %s237_s14, %s237_s14 }
   0xb   :  { %p244_p3 = por %p243_p2, %p242_p1 }
   0xd   :  { %p245_p4 = pnand %p244_p3, %p238_p0 }
   0xf   :  { %248 = shalt.err (!%p245_p4)
}
  0x10   :  { %s277_s15 = smov 256   ;;  %s278_s16 = smov 16  }
  0x11   :  { %24 = dma.hbm_to_vmem [thread:$0]  %s333_s1, 512, %s19_s13, [#allocation5], %s277_s15, %s277_s15, %s278_s16  }
  0x12   :  { %271 = dma.done.wait [#allocation5], 512  }
  0x13   :  { %272 = vsyncadd [#allocation5], 4294966784  ;;  %v306_v0 = vld [vmem:[#allocation4] sm:$0xff]  ;;  %v308_v1 = vld [vmem:[#allocation4 + $0x8] sm:$0xff]  ;;  %v49_v8 = vlaneseq  ;;  %s56_s1 = sld [smem:[#allocation3]]  ;;  %v279_v20 = vmov 0.0  }
  0x14   :  { %v310_v2 = vld [vmem:[#allocation4 + $0x10] sm:$0xff]  ;;  %v32_v3 = vadd.f32 %v308_v1, %v306_v0  ;;  %v41_v4 = vmax.f32 %v306_v0, %v308_v1  ;;  %v316_v5 = vld [vmem:[#allocation4 + $0x18] sm:$0xff]  ;;  %s199_s18 = sld [smem:[#allocation3 + $0x1]]  ;;  %205 = vmatprep.subr.mxu0 %v279_v20  ;;  %vm280_vm3 = vmmov 0   ;;  %vm79_vm4 = vcmask 1041409   ;;  %s281_s20 = smov [#allocation7]  }
  0x15   :  { %v35_v6 = vadd.f32 %v316_v5, %v310_v2  ;;  %v44_v7 = vmax.f32 %v310_v2, %v316_v5  ;;  %v50_v9 = vshrl.u32 %v49_v8, 7  ;;  %v52_v10 = vand.u32 127, %v49_v8  ;;  %s200_s19 = sld [smem:[#allocation3 + $0x2]]  ;;  %207 = vmatprep.mubr.msk.f32.mxu0 %vm280_vm3, %v279_v20  ;;  %s187_s21 = sshll.u32 %s281_s20, 4  ;;  %s188_s21 = int_to_ptr.vmem [resolvable:$true] %s187_s21 }
  0x16   :  { %33 = vadd.xlane.f32.xlu0 %v32_v3  ;;  %42 = vmax.xlane.f32.xlu1 %v41_v4  ;;  %vm81_vm5 = vcmask 64512   ;;  %s249_s22 = scalar_lea.vmem %s188_s21, 512  ;;  %p254_p6 = scmp.lt.s32.totalorder %s188_s21, %s188_s21 }
  0x17   :  { %v53_v11 = vsub.s32 %v50_v9, %v52_v10  ;;  %v73_v27 = vsub.s32 %v52_v10, %v50_v9  ;;  %v169_v39 = vsub.s32 1, %v50_v9  ;;  %v162_v40 = vsub.s32 0, %v50_v9  ;;  %p250_p5 = scmp.ne.s32.totalorder %s188_s21, %s249_s22  ;;  %p255_p7 = scmp.lt.s32.totalorder %s249_s22, %s249_s22 }
  0x19   :  { %v54_v12 = vadd.s32 1, %v53_v11  ;;  %v57_v13 = vstv %s56_s1  ;;  %p256_p8 = por %p255_p7, %p254_p6 }
  0x1a   :  { %36 = vadd.xlane.f32.xlu0 %v35_v6  ;;  %45 = vmax.xlane.f32.xlu1 %v44_v7  ;;  %v61_v15 = vstv %s199_s18 }
  0x1b   :  { %vm55_vm0 = vcmp.eq.s32.totalorder %v54_v12, 0  ;;  %vm59_vm1 = vcmp.eq.s32.totalorder %v54_v12, 1  ;;  %vm64_vm2 = vcmp.eq.s32.totalorder %v54_v12, 2  ;;  %v66_v17 = vstv %s200_s19  ;;  %p257_p9 = pnand %p256_p8, %p250_p5 }
  0x1c   :  { %v58_v14 = vsel %vm55_vm0, %v57_v13, 0.0  ;;  %v62_v16 = vsel %vm59_vm1, %v61_v15, 0.0  ;;  %v67_v19 = vsel %vm64_vm2, %v66_v17, 0.0 }
  0x1d   :  { %v63_v18 = vadd.f32 %v62_v16, %v58_v14 }
  0x1f   :  { %v68_v21 = vadd.f32 %v67_v19, %v63_v18 }
  0x21   :  { %206 = vmatpush3.msra.mxu0 %v68_v21 }
  0x9f   :  { %v34_v22 = vpop.xlane.xlu0 %33  ;;  %v43_v23 = vpop.xlane.xlu1 %42 }
  0xa0   :  { %v39_v24 = vmul.f32 0.00390625, %v34_v22 }
  0xa2   :  { %v47_v28 = vadd.f32 %v43_v23, %v39_v24 }
  0xa3   :  { %v37_v25 = vpop.xlane.xlu0 %36  ;;  %v46_v26 = vpop.xlane.xlu1 %45 }
  0xa4   :  { %v40_v29 = vmul.f32 0.00390625, %v37_v25  ;;  %v74_v31 = vrot.slane %v47_v28, %v73_v27 }
  0xa6   :  { %v48_v30 = vadd.f32 %v46_v26, %v40_v29 }
  0xa8   :  { %v78_v32 = vrot.slane %v48_v30, %v73_v27 }
  0xaa   :  { %v80_v33 = vsel %vm79_vm4, %v78_v32, %v74_v31 }
  0xab   :  { %208 = vmatmul.mubr.msk.f32.vlgmr.msra.gmra.mxu0 %vm81_vm5, %v80_v33 }
 0x16b   :  { %v150_v34 = vpop.f32.mrf.mxu0 }
 0x16c   :  { %v202_v35 = vmul.f32 -1.442695, %v150_v34 }
 0x16d   :  { %v209_v36 = vpop.f32.mrf.mxu0 }
 0x16e   :  { %217 = vpow2.f32 %v202_v35 }
 0x17b   :  { %v218_v37 = vpop.eup %217 }
 0x17c   :  { %v157_v38 = vadd.f32 1.0, %v218_v37 }
 0x17e   :  { %219 = vrcp.f32 %v157_v38 }
 0x18b   :  { %v220_v41 = vpop.eup %219 }
 0x18c   :  { %v170_v42 = vrot.slane %v220_v41, %v169_v39  ;;  %v163_v43 = vrot.slane %v220_v41, %v162_v40 }
 0x18e   :  { %172 = vbcast.lane.b32.xlu1 %v170_v42, 256  ;;  %165 = vbcast.lane.b32.xlu0 %v163_v43, 256 }
 0x200   :  { %v173_v44 = vpop.permute.xlu1 %172  ;;  %v166_v45 = vpop.permute.xlu0 %165 }
 0x201   :  { %v176_v46 = vmul.f32 %v173_v44, %v310_v2  ;;  %v177_v47 = vmul.f32 %v173_v44, %v316_v5  ;;  %v174_v48 = vmul.f32 %v166_v45, %v306_v0  ;;  %v175_v49 = vmul.f32 %v166_v45, %v308_v1 }
 0x203   :  { %180 = vst [vmem:[#allocation7 + $0x10] sm:$0xff] %v176_v46  ;;  %181 = vst [vmem:[#allocation7 + $0x18] sm:$0xff] %v177_v47 }
 0x204   :  { %178 = vst [vmem:[#allocation7] sm:$0xff] %v174_v48  ;;  %179 = vst [vmem:[#allocation7 + $0x8] sm:$0xff] %v175_v49 }
 0x205   :  { %260 = shalt.err (!%p257_p9)
}
 0x206   :  { %193 = dma.vmem_to_hbm [thread:$0]  %s188_s21, 512, %s334_s2, [#allocation6], %s277_s15, %s277_s15, %s278_s16  }
 0x207   :  { %273 = dma.done.wait [#allocation6], 512  }
 0x208   :  { %274 = vsyncadd [#allocation6], 4294966784 }
 0x209   :  { %197 = vsyncpa [#allocation5], 1 }
 0x20a   :  { %198 = vsyncpa [#allocation6], 1 }

</bundles_post_ra>
